<compile_context>
chip_gen: v6e
topology: v6e:2x2x1
jax: 0.10.0
libtpu: 0.0.40
codegen_flags: <defaults>
</compile_context>

<pallas_src>
import math
import functools

import jax
import jax.numpy as jnp
from jax.experimental import pallas as pl
from jax.experimental.pallas import tpu as pltpu

HIDDEN = 100      # fixed by the module (nn.Embedding(num_entities, 100))
D_PAD = 128       # feature dims padded to one full lane tile


def _round_up(x, m):
    return (x + m - 1) // m * m


def _vmem_budget_bytes():
    """Per-generation VMEM budget for the kernel working set (with headroom)."""
    cap = 64 << 20
    try:
        info = pltpu.get_tpu_info()
        cap = int(getattr(info, "vmem_capacity_bytes", cap))
    except Exception:
        pass
    return max(16 << 20, min(int(0.45 * cap), 56 << 20))


def _choose_tile(n_nodes, tm, compute_dtype, vmem_budget_bytes):
    """Largest node tile (multiple of 16) whose working set fits the budget."""
    cbytes = jnp.dtype(compute_dtype).itemsize
    n_min = _round_up(max(n_nodes, 16), 16)
    tile = min(_round_up(tm, 16), n_min)
    while tile > 16:
        n_pad = _round_up(n_min, tile)
        working = (2 * tile * n_pad * cbytes      # A~ node-tile (double-buffered)
                   + 2 * n_pad * D_PAD * cbytes   # Y_b slab (double-buffered)
                   + 4 * tile * D_PAD * 4)        # seed + output tiles (f32)
        if working <= vmem_budget_bytes:
            break
        tile = max(16, _round_up(tile // 2, 16))
    n_pad = _round_up(n_min, tile)
    return tile, n_pad


# ------------------------------ Pallas kernel --------------------------------
def _rgcn_conv_kernel(a_ref, y_ref, seed_ref, o_ref):
    """One (node-tile i, basis b) grid step of
         out = seed + sum_b A~_b @ Y_b
       with seed = X @ root + bias and Y_b = X @ basis_b precomputed in XLA.
       The (tile, 128) output block itself is the resident f32 accumulator."""
    b = pl.program_id(1)

    @pl.when(b == 0)
    def _():
        o_ref[...] = seed_ref[...]

    # (tile, N) @ (N, 128) on MXU (bf16 in, f32 acc), accumulated in place.
    o_ref[...] += jnp.dot(a_ref[...], y_ref[...],
                          preferred_element_type=jnp.float32)


def rgcn_conv_padded(x_p, a_tilde, basis_p, root_p, bias_p, *, tile,
                     compute_dtype=jnp.bfloat16, vmem_limit_bytes=None):
    """One RGCNConv layer on padded operands.

    x_p     : (N_pad, 128) f32 node features
    a_tilde : (B, N_pad, N_pad) compute_dtype, att-combined + mean-normalized
    basis_p : (B, 128, 128) f32;  root_p: (128, 128) f32;  bias_p: (1, 128) f32
    returns : (N_pad, 128) f32
    """
    n_pad, d_pad = x_p.shape
    num_bases = basis_p.shape[0]
    assert n_pad % tile == 0 and tile % 8 == 0
    cbytes = jnp.dtype(compute_dtype).itemsize

    # Hoisted out of the mem-bound inner loop: B small matmuls + one root
    # matmul in XLA cost ~128/N of the kernel's work and remove the in-kernel
    # (tile,128) f32 intermediate and three extra input streams.
    y_all = jnp.einsum('nd,bde->bne', x_p, basis_p).astype(compute_dtype)
    seed = (x_p @ root_p + bias_p).astype(jnp.float32)

    grid = (n_pad // tile, num_bases)

    if vmem_limit_bytes is None:
        working = (2 * tile * n_pad * cbytes      # A~ node-tile, double-buffered
                   + 2 * n_pad * d_pad * cbytes   # Y_b slab, double-buffered
                   + 2 * tile * d_pad * 4         # seed tile
                   + 2 * tile * d_pad * 4)        # output tile
        vmem_limit_bytes = int(min(max(2 * working + (2 << 20), 16 << 20),
                                   64 << 20))

    cost = pl.CostEstimate(
        flops=2 * num_bases * n_pad * n_pad * d_pad,
        transcendentals=0,
        bytes_accessed=(num_bases * n_pad * n_pad * cbytes          # A~ stream
                        + grid[0] * num_bases * n_pad * d_pad * cbytes  # Y re-reads
                        + 2 * n_pad * d_pad * 4))                   # seed + out

    return pl.pallas_call(
        _rgcn_conv_kernel,
        out_shape=jax.ShapeDtypeStruct((n_pad, d_pad), jnp.float32),
        grid=grid,
        in_specs=[
            # A~_b node-tile: the dominant streaming operand (HBM-bound).
            pl.BlockSpec((pl.Squeezed(), tile, n_pad), lambda i, b: (b, i, 0)),
            # Y_b = X @ basis_b: re-DMAed per basis step (b is the inner axis).
            pl.BlockSpec((pl.Squeezed(), n_pad, d_pad), lambda i, b: (b, 0, 0)),
            # seed = X @ root + bias: re-DMAed only when the node tile changes.
            pl.BlockSpec((tile, d_pad), lambda i, b: (i, 0)),
        ],
        out_specs=pl.BlockSpec((tile, d_pad), lambda i, b: (i, 0)),
        compiler_params=pltpu.CompilerParams(
            dimension_semantics=("parallel", "arbitrary"),
            vmem_limit_bytes=vmem_limit_bytes),
        cost_estimate=cost,
    )(a_tilde, y_all, seed)


# ------------------------------ wrapper glue ---------------------------------
def build_graph_operators(edge_index, edge_type, edge_norm, num_relations,
                          n_nodes, n_pad):
    """Dense per-relation adjacency with the mean normalization folded in.
    Built ONCE per forward pass, shared by every conv application."""
    src, tgt = edge_index[0], edge_index[1]
    norm = (edge_norm if edge_norm is not None
            else jnp.ones(edge_type.shape, jnp.float32)).astype(jnp.float32)
    adj = jnp.zeros((num_relations, n_pad, n_pad), jnp.float32)
    adj = adj.at[edge_type, tgt, src].add(norm)
    deg = jnp.zeros((n_pad,), jnp.float32).at[tgt].add(1.0)
    inv_deg = 1.0 / jnp.maximum(deg, 1.0)
    # Row scaling commutes with the sums over relations/bases -> fold it in.
    return adj * inv_deg[None, :, None]
    # TODO(synk): for large graphs (N >~ 30-50k) the dense B*N^2 materialization
    # is a capacity concern before a speed one; switch to a scalar-prefetch
    # CSR/segment formulation.


def combine_bases(adj_norm, att, compute_dtype):
    """A~_b = sum_r att[r, b] * A_r : folds the basis decomposition into the
    adjacency so the kernel reduces over num_bases instead of num_relations."""
    return jnp.einsum('rb,rij->bij', att, adj_norm).astype(compute_dtype)


def _pad_conv_params(basis, root, bias):
    num_bases, d_in, d_out = basis.shape
    basis_p = jnp.zeros((num_bases, D_PAD, D_PAD), jnp.float32)
    basis_p = basis_p.at[:, :d_in, :d_out].set(basis)
    root_p = jnp.zeros((D_PAD, D_PAD), jnp.float32).at[:d_in, :d_out].set(root)
    bias_p = jnp.zeros((1, D_PAD), jnp.float32).at[0, :d_out].set(bias)
    return basis_p, root_p, bias_p


def rgcn_forward(entity, edge_index, edge_type, edge_norm, emb_table,
                 conv1_params, conv2_params, dropout_p, dropout_key,
                 training=True, compute_dtype=jnp.bfloat16, tm=512):
    """RGCN.forward: embed -> conv1 -> relu(conv1) -> dropout -> conv2
    (conv1 applied twice, exactly as in the PyTorch module)."""
    basis1, att1, root1, bias1 = conv1_params
    basis2, att2, root2, bias2 = conv2_params
    num_rel = att1.shape[0]

    x = emb_table[entity].astype(jnp.float32)        # embedding lookup (glue)
    n_nodes, d_in = x.shape
    d_out = basis2.shape[-1]

    # Node tile: biggest (multiple of 16) whose double-buffered working set
    # fits this generation's VMEM budget (v7x 64 MiB per-TC caps it lower).
    tile, n_pad = _choose_tile(n_nodes, tm, compute_dtype, _vmem_budget_bytes())

    # Graph operators built once, reused across all three conv applications.
    adj_norm = build_graph_operators(edge_index, edge_type, edge_norm,
                                     num_rel, n_nodes, n_pad)
    a1 = combine_bases(adj_norm, att1, compute_dtype)   # conv1 (used twice)
    a2 = combine_bases(adj_norm, att2, compute_dtype)
    p1 = _pad_conv_params(basis1, root1, bias1)
    p2 = _pad_conv_params(basis2, root2, bias2)

    x_p = jnp.zeros((n_pad, D_PAD), jnp.float32).at[:n_nodes, :d_in].set(x)

    conv = functools.partial(rgcn_conv_padded, tile=tile,
                             compute_dtype=compute_dtype)
    x_p = conv(x_p, a1, *p1)                        # x = conv1(x)
    x_p = jax.nn.relu(conv(x_p, a1, *p1))           # x = relu(conv1(x))
    if training and dropout_p > 0.0:
        # TODO(synk): torch RNG stream not reproducible; mask drawn with jax.random.
        keep = jax.random.bernoulli(dropout_key, 1.0 - dropout_p, x_p.shape)
        x_p = jnp.where(keep, x_p / (1.0 - dropout_p), 0.0)
    x_p = conv(x_p, a2, *p2)                        # x = conv2(x)
    return x_p[:n_nodes, :d_out]


# ----------------------------- pure-JAX reference ----------------------------
def rgcn_conv_ref(x, edge_index, edge_type, edge_norm, basis, att, root, bias):
    num_bases, d_in, d_out = basis.shape
    num_rel = att.shape[0]
    n_nodes = x.shape[0]
    w = (att @ basis.reshape(num_bases, -1)).reshape(num_rel, d_in, d_out)
    src, tgt = edge_index[0], edge_index[1]
    msg = jnp.einsum('ed,edo->eo', x[src], w[edge_type]) * edge_norm[:, None]
    summed = jax.ops.segment_sum(msg, tgt, num_segments=n_nodes)
    cnt = jax.ops.segment_sum(jnp.ones_like(edge_norm), tgt, num_segments=n_nodes)
    aggr = summed / jnp.maximum(cnt, 1.0)[:, None]
    return aggr + x @ root + bias


def rgcn_forward_ref(entity, edge_index, edge_type, edge_norm, emb_table,
                     conv1_p, conv2_p):
    x = emb_table[entity]
    x = rgcn_conv_ref(x, edge_index, edge_type, edge_norm, *conv1_p)
    x = jax.nn.relu(rgcn_conv_ref(x, edge_index, edge_type, edge_norm, *conv1_p))
    x = rgcn_conv_ref(x, edge_index, edge_type, edge_norm, *conv2_p)
    return x


# ----------------------------------- main ------------------------------------
if __name__ == "__main__":
    num_entities, num_relations, num_bases, dropout = 16, 4, 4, 0.2
    D = HIDDEN
    R = num_relations * 2          # RGCN builds convs with num_relations * 2
    E = 32

    key = jax.random.PRNGKey(0)
    keys = jax.random.split(key, 10)

    # Deterministic parameter init mirroring the module's reset_parameters.
    emb_table = jax.random.normal(keys[0], (num_entities, D), jnp.float32)

    def conv_params(k):
        bound = 1.0 / math.sqrt(num_bases * D)
        k1, k2, k3, k4 = jax.random.split(k, 4)
        basis = jax.random.uniform(k1, (num_bases, D, D), jnp.float32, -bound, bound)
        att = jax.random.uniform(k2, (R, num_bases), jnp.float32, -bound, bound)
        root = jax.random.uniform(k3, (D, D), jnp.float32, -bound, bound)
        bias = jax.random.uniform(k4, (D,), jnp.float32, -bound, bound)
        return basis, att, root, bias

    conv1_p = conv_params(keys[1])
    conv2_p = conv_params(keys[2])

    # Example graph inputs.
    entity = jnp.arange(num_entities, dtype=jnp.int32)
    src = jax.random.randint(keys[3], (E,), 0, num_entities, dtype=jnp.int32)
    tgt = jax.random.randint(keys[4], (E,), 0, num_entities, dtype=jnp.int32)
    edge_index = jnp.stack([src, tgt])
    edge_type = jax.random.randint(keys[5], (E,), 0, R, dtype=jnp.int32)
    edge_norm = jax.random.uniform(keys[6], (E,), jnp.float32, 0.5, 1.0)

    # Pure-JAX per-edge reference (dropout off).
    ref = rgcn_forward_ref(entity, edge_index, edge_type, edge_norm, emb_table,
                           conv1_p, conv2_p)

    # 1) f32 kernel path: tight check of the algebraic rewrite / tiling.
    out_f32 = rgcn_forward(entity, edge_index, edge_type, edge_norm, emb_table,
                           conv1_p, conv2_p, dropout, keys[7], training=False,
                           compute_dtype=jnp.float32)
    out_f32 = jax.block_until_ready(out_f32)
    assert out_f32.shape == (num_entities, D)
    assert jnp.allclose(out_f32, ref, rtol=2e-3, atol=2e-3), "f32 mismatch vs reference"

    # 2) bf16 kernel path (production setting): A~ and X@basis in bf16,
    #    f32 MXU accumulation; looser tolerance for the quantization.
    out_bf16 = rgcn_forward(entity, edge_index, edge_type, edge_norm, emb_table,
                            conv1_p, conv2_p, dropout, keys[7], training=False,
                            compute_dtype=jnp.bfloat16)
    out_bf16 = jax.block_until_ready(out_bf16)
    assert out_bf16.shape == (num_entities, D)
    assert jnp.allclose(out_bf16, ref, rtol=5e-2, atol=5e-2), "bf16 mismatch vs reference"

    print("KERNEL_OK")
</pallas_src>

<mosaic_0001>
module attributes {stable_mosaic.version = 11 : i64} {
  func.func @_rgcn_conv_kernel(%arg0: i32, %arg1: i32, %arg2: memref<1x16x16xf32, #tpu.memory_space<vmem>>, %arg3: memref<1x16x128xf32, #tpu.memory_space<vmem>>, %arg4: memref<16x128xf32, #tpu.memory_space<vmem>>, %arg5: memref<16x128xf32, #tpu.memory_space<vmem>>) attributes {dimension_semantics = [#tpu.dimension_semantics<parallel>, #tpu.dimension_semantics<arbitrary>], iteration_bounds = array<i64: 1, 4>, scalar_prefetch = 0 : i64, scratch_operands = 0 : i64, tpu.core_type = #tpu.core_type<tc>, window_params = [{transform_indices = @transform_0, window_bounds = array<i64: 1, 16, 16>}, {transform_indices = @transform_1, window_bounds = array<i64: 1, 16, 128>}, {transform_indices = @transform_2, window_bounds = array<i64: 16, 128>}, {transform_indices = @transform_3, window_bounds = array<i64: 16, 128>}]} {
    %c0_i32 = arith.constant 0 : i32
    %0 = arith.cmpi eq, %arg1, %c0_i32 : i32
    %1 = arith.extui %0 : i1 to i32
    %c0_i32_0 = arith.constant 0 : i32
    %2 = arith.cmpi ne, %1, %c0_i32_0 : i32
    scf.if %2 {
      %c0_10 = arith.constant 0 : index
      %c0_11 = arith.constant 0 : index
      %11 = vector.load %arg4[%c0_10, %c0_11] : memref<16x128xf32, #tpu.memory_space<vmem>>, vector<16x128xf32>
      %c0_12 = arith.constant 0 : index
      %c0_13 = arith.constant 0 : index
      %12 = vector.load %arg5[%c0_12, %c0_13] : memref<16x128xf32, #tpu.memory_space<vmem>>, vector<16x128xf32>
      tpu.vector_store %arg5[%c0_12, %c0_13], %11 {strides = array<i32>} : memref<16x128xf32, #tpu.memory_space<vmem>>, vector<16x128xf32>,
    } else {
    }
    %c0 = arith.constant 0 : index
    %c0_1 = arith.constant 0 : index
    %3 = vector.load %arg5[%c0, %c0_1] : memref<16x128xf32, #tpu.memory_space<vmem>>, vector<16x128xf32>
    %c0_2 = arith.constant 0 : index
    %c0_3 = arith.constant 0 : index
    %c0_4 = arith.constant 0 : index
    %4 = vector.load %arg2[%c0_2, %c0_3, %c0_4] : memref<1x16x16xf32, #tpu.memory_space<vmem>>, vector<1x16x16xf32>
    %5 = vector.shape_cast %4 : vector<1x16x16xf32> to vector<16x16xf32>
    %c0_5 = arith.constant 0 : index
    %c0_6 = arith.constant 0 : index
    %c0_7 = arith.constant 0 : index
    %6 = vector.load %arg3[%c0_5, %c0_6, %c0_7] : memref<1x16x128xf32, #tpu.memory_space<vmem>>, vector<1x16x128xf32>
    %7 = vector.shape_cast %6 : vector<1x16x128xf32> to vector<16x128xf32>
    %cst = arith.constant dense<0.000000e+00> : vector<16x128xf32>
    %8 = tpu.matmul %5, %7, %cst {dimension_numbers = #tpu.dot_dimension_numbers<[1], [0], [0], [1], [0, 0, 1, 1], [], []>} : vector<16x16xf32>, vector<16x128xf32>, vector<16x128xf32> -> vector<16x128xf32>
    %9 = arith.addf %3, %8 : vector<16x128xf32>
    %c0_8 = arith.constant 0 : index
    %c0_9 = arith.constant 0 : index
    %10 = vector.load %arg5[%c0_8, %c0_9] : memref<16x128xf32, #tpu.memory_space<vmem>>, vector<16x128xf32>
    tpu.vector_store %arg5[%c0_8, %c0_9], %9 {strides = array<i32>} : memref<16x128xf32, #tpu.memory_space<vmem>>, vector<16x128xf32>,
    return
  }
  func.func @transform_0(%arg0: i32, %arg1: i32) -> (i32, i32, i32) {
    %c0_i32 = arith.constant 0 : i32
    %c0_i32_0 = arith.constant 0 : i32
    return %arg1, %arg0, %c0_i32 : i32, i32, i32
  }
  func.func @transform_1(%arg0: i32, %arg1: i32) -> (i32, i32, i32) {
    %c0_i32 = arith.constant 0 : i32
    %c0_i32_0 = arith.constant 0 : i32
    %c0_i32_1 = arith.constant 0 : i32
    return %arg1, %c0_i32, %c0_i32_0 : i32, i32, i32
  }
  func.func @transform_2(%arg0: i32, %arg1: i32) -> (i32, i32) {
    %c0_i32 = arith.constant 0 : i32
    %c0_i32_0 = arith.constant 0 : i32
    return %arg0, %c0_i32 : i32, i32
  }
  func.func @transform_3(%arg0: i32, %arg1: i32) -> (i32, i32) {
    %c0_i32 = arith.constant 0 : i32
    %c0_i32_0 = arith.constant 0 : i32
    return %arg0, %c0_i32 : i32, i32
  }
}

</mosaic_0001>

<bundles_post_ra>
// kernel: tpu_custom_call.1
= control target key start
LH: loop header
LB: loop body
LE: loop exit
PB: predicated region body
PF: predicated region fallthrough
CT: control target
= control target key end

     0   :  { %8 = vsyncpa [#allocation3], 0  ;;  %s948_s0 = inlined_call_operand.hbm [shape: f32[4,16,16], index: 0, kind: input, shape index: {}]   ;;  %s949_s1 = inlined_call_operand.hbm [shape: f32[4,16,128], index: 1, kind: input, shape index: {}]   ;;  %s950_s2 = inlined_call_operand.hbm [shape: f32[16,128], index: 2, kind: input, shape index: {}]   ;;  %s951_s3 = inlined_call_operand.hbm [shape: f32[16,128], index: 3, kind: output, shape index: {}]  }
   0x1   :  { %10 = vsyncpa [#allocation3 + $0x1], 0 }
   0x2   :  { %11 = vsyncpa [#allocation6], 0 }
   0x3   :  { %13 = vsyncpa [#allocation6 + $0x1], 0 }
   0x4   :  { %14 = vsyncpa [#allocation4], 0  ;;  %s787_s12 = smov 0   ;;  %s789_s13 = smov 0  }
   0x5   :  { %s791_s14 = smov 0   ;;  %s793_s15 = smov 0  }
   0x6   :  { %s795_s16 = smov 0   ;;  %s797_s17 = smov 0  }
   0x7 LB: > { %s816_s18 = sadd.s32 4294967295, %s757_s17   ;;  %p54_p0 = scmp.ne.s32.totalorder %s741_s13, %s737_s12  ;;  %s757_s17 = sphi %s797_s17, %s20_s17   ;;  %s753_s16 = sphi %s795_s16, %s960_s16   ;;  %s749_s15 = sphi %s793_s15, %s959_s15   ;;  %s745_s14 = sphi %s791_s14, %s958_s14   ;;  %s741_s13 = sphi %s789_s13, %s957_s13   ;;  %s737_s12 = sphi %s787_s12, %s956_s12  }
   0x8   : > { %p55_p1 = scmp.eq.s32.totalorder %s816_s18, 0  ;;  %p474_p2 = scmp.ge.s32.totalorder %s757_s17, 1 }
   0x9   : > { %p143_p3 = scmp.lt.s32.totalorder %s757_s17, 5  ;;  %s759_s21 = smov [#allocation7]  }
   0xa   : > { %p824_p4 = por %p55_p1, %p54_p0  ;;  %s158_s22 = sshll.u32 %s759_s21, 4  ;;  %s159_s22 = int_to_ptr.vmem [resolvable:$true] %s158_s22 }
   0xb   : > { %p828_p5 = pnand %p474_p2, %p143_p3  ;;  %s29_s24 = sadd.s32 1, %s753_s16 }
   0xc   : > { %s600_s25 = scalar_lea.vmem %s159_s22, 256  ;;  %p608_p12 = scmp.lt.s32.totalorder %s159_s22, %s159_s22 }
   0xd   : > { %p519_p6 = pneg %p828_p5  ;;  %p601_p9 = scmp.ne.s32.totalorder %s159_s22, %s600_s25 }
   0xe   : > { %p609_p13 = scmp.lt.s32.totalorder %s600_s25, %s600_s25 }
   0xf   : > { %p836_p7 = pnand %p519_p6, %p55_p1 }
  0x10   : > { %p610_p0 = por %p609_p13, %p608_p12 }
  0x11   : > { %p591_p8 = pneg %p836_p7 }
  0x13   : > { %p603_p10 = pnand %p601_p9, %p591_p8 }
  0x15   : > { %p604_p11 = pneg %p603_p10 }
  0x17   : > { %p611_p2 = pnand %p610_p0, %p604_p11 }
  0x19   : > { %614 = shalt.err (!%p611_p2)
}
  0x1a   : > { %s760_s26 = smov 128   ;;  %s761_s27 = smov 8  }
  0x1b   : > { %522 = dma.hbm_to_vmem [thread:$0]  (!%p836_p7), %s950_s2, 256, %s159_s22, [#allocation6], %s760_s26, %s760_s26, %s761_s27  }
  0x1c   : > { %p30_p3 = scmp.ge.s32.totalorder %s29_s24, 4  ;;  %s41_s30 = sadd.s32 1, %s745_s14 }
  0x1d   : > { %p48_p6 = scmp.ne.s32.totalorder %s745_s14, %s741_s13  ;;  %p49_p8 = scmp.eq.s32.totalorder %s757_s17, 0 }
  0x1e   : > { %s962_s24 = smov (%p30_p3, %s29_s24), 0  ;;  %p531_p10 = scmp.lt.s32.totalorder %s757_s17, 4 }
  0x1f   : > { %p50_p9 = por %p49_p8, %p48_p6  ;;  %s36_s4 = ssub.s32 %s753_s16, %s962_s24 }
  0x20   : > { %s172_s5 = sand.u32 1, %s745_s14   ;;  %p39_p11 = scmp.eq.s32.totalorder %s36_s4, 0 }
  0x21   : > { %s861_s6 = sshll.u32 %s172_s5, 4  ;;  %s494_s7 = sshll.u32 %s753_s16, 8 }
  0x22   : > { %s865_s8 = scalar_select %p39_p11, %s745_s14, %s41_s30  }
  0x23   : > { %s184_s11 = scalar_lea.hbm %s948_s0, %s494_s7  ;;  %s176_s12 = scalar_lea.vmem [#allocation2], %s861_s6 }
  0x24   : > { %s185_s21 = sshll.u32 %s176_s12, 4  ;;  %p871_p7 = pnand %p531_p10, %p50_p9  ;;  %s186_s21 = int_to_ptr.vmem [resolvable:$true] %s185_s21 }
  0x25   : > { %s878_s28 = scalar_lea.hbm %s949_s1, %s494_s7  ;;  %s173_s29 = scalar_lea.sflag [#allocation3], %s172_s5 }
  0x26   : > { %p617_p12 = pneg %p871_p7  ;;  %s628_s30 = scalar_lea.vmem %s186_s21, 256 }
  0x27   : > { %p629_p13 = scmp.ne.s32.totalorder %s186_s21, %s628_s30  ;;  %s762_s4 = smov [#allocation2]  }
  0x28   : > { %s633_s9 = sshll.u32 %s762_s4, 4  ;;  %s634_s9 = int_to_ptr.vmem [resolvable:$false] %s633_s9 }
  0x29   : > { %p631_p0 = pnand %p629_p13, %p617_p12  ;;  %s635_s10 = scalar_lea.vmem %s634_s9, 512 }
  0x2a   : > { %p636_p3 = scmp.lt.s32.totalorder %s186_s21, %s634_s9  ;;  %p637_p6 = scmp.lt.s32.totalorder %s635_s10, %s628_s30 }
  0x2b   : > { %p632_p2 = pneg %p631_p0 }
  0x2c   : > { %p638_p8 = por %p637_p6, %p636_p3 }
  0x2e   : > { %p639_p9 = pnand %p638_p8, %p632_p2 }
  0x30   : > { %642 = shalt.err (!%p639_p9)
}
  0x31   : > { %526 = dma.hbm_to_vmem [thread:$0]  (!%p871_p7), %s184_s11, 256, %s186_s21, %s173_s29, %s760_s26, %s760_s26, %s761_s27  }
  0x32   : > { %s199_s5 = scalar_lea.vmem [#allocation5], %s861_s6  ;;  %s195_s12 = sand.u32 1, %s757_s17  }
  0x33   : > { %s206_s7 = sshll.u32 %s199_s5, 4  ;;  %s196_s23 = scalar_lea.sflag [#allocation6], %s195_s12  ;;  %s207_s7 = int_to_ptr.vmem [resolvable:$true] %s206_s7 }
  0x34   : > { %s656_s25 = scalar_lea.vmem %s207_s7, 256  ;;  %s763_s30 = smov [#allocation5]  }
  0x35   : > { %p657_p10 = scmp.ne.s32.totalorder %s207_s7, %s656_s25  ;;  %s661_s4 = sshll.u32 %s763_s30, 4  ;;  %s662_s4 = int_to_ptr.vmem [resolvable:$false] %s661_s4 }
  0x36   : > { %s663_s9 = scalar_lea.vmem %s662_s4, 512  ;;  %p664_p0 = scmp.lt.s32.totalorder %s207_s7, %s662_s4 }
  0x37   : > { %p659_p11 = pnand %p657_p10, %p617_p12  ;;  %p665_p2 = scmp.lt.s32.totalorder %s663_s9, %s656_s25 }
  0x39   : > { %p660_p13 = pneg %p659_p11  ;;  %p666_p3 = por %p665_p2, %p664_p0 }
  0x3b   : > { %p667_p6 = pnand %p666_p3, %p660_p13 }
  0x3d   : > { %670 = shalt.err (!%p667_p6)
}
  0x3e   : > { %529 = dma.hbm_to_vmem [thread:$0]  (!%p871_p7), %s878_s28, 256, %s207_s7, %s196_s23, %s760_s26, %s760_s26, %s761_s27  }
  0x3f   : > { %218 = sbr.rel (%p828_p5) target bundleno = 291 (0x123), region = 32  ;;  %s220_s6 = sand.u32 (!%p828_p5), 1, %s741_s13  }
  0x40   : > { %s484_s11 = sshll.u32 (!%p828_p5), %s220_s6, 4  ;;  %s221_s21 = scalar_lea.sflag (!%p828_p5), [#allocation3], %s220_s6 }
  0x41   : > { %s224_s29 = scalar_lea.vmem (!%p828_p5), [#allocation2], %s484_s11 }
  0x44   : > { %720 = dma.done.wait (%p824_p4), %s221_s21, 256  }
  0x45   : > { %722 = vsyncadd (%p824_p4), %s221_s21, 4294967040  ;;  %s229_s22 = sand.u32 1, %s816_s18   ;;  %s233_s5 = scalar_lea.vmem [#allocation5], %s484_s11 }
  0x46   : > { %s230_s10 = scalar_lea.sflag [#allocation6], %s229_s22 }
  0x47   : > { %724 = dma.done.wait (%p824_p4), %s230_s10, 256  }
  0x48   : > { %726 = vsyncadd (%p824_p4), %s230_s10, 4294967040 }
  0x49   : > { %728 = dma.done.wait (%p55_p1), [#allocation6], 256  }
  0x4a   : > { %730 = vsyncadd (%p55_p1), [#allocation6], 4294967040  ;;  %p487_p5 = scmp.ne.s32.totalorder %s749_s15, 0 }
  0x4c   : > { %266 = sbr.rel (%p487_p5) target bundleno = 83 (0x53), region = 48 }
  0x51   : > { %v267_v0 = vld [vmem:[#allocation7] sm:$0xff]  ;;  %v268_v1 = vld [vmem:[#allocation7 + $0x8] sm:$0xff] }
  0x52   : > { %269 = vst [vmem:[#allocation8] sm:$0xff] %v267_v0  ;;  %270 = vst [vmem:[#allocation8 + $0x8] sm:$0xff] %v268_v1 }
  0x53 PF: > { %v276_v2 = vld [vmem:[%s233_s5 + $0x8] sm:$0xff]  ;;  %v275_v3 = vld [vmem:[%s233_s5] sm:$0xff]  ;;  %vm277_vm0 = vcmask 130048   ;;  %s764_s15 = smov [#allocation8]   ;;  %p533_p1 = scmp.eq.s32.totalorder %s816_s18, 3 }
  0x54   : > { %v273_v4 = vld [vmem:[%s224_s29] sm:$0xff]  ;;  %500 = vmatprep.subr.mxu0 %v276_v2  ;;  %v274_v5 = vld [vmem:[%s224_s29 + $0x8] sm:$0xff]  ;;  %s372_s19 = sshll.u32 %s764_s15, 4  ;;  %s373_s19 = int_to_ptr.vmem [resolvable:$true] %s372_s19 }
  0x55   : > { %504 = vmatprep.mubr.msk.f32.mxu0 %vm277_vm0, %v273_v4  ;;  %501 = vmatpush3.msra.mxu0 %v276_v2  ;;  %s671_s20 = scalar_lea.vmem %s373_s19, 256  ;;  %p678_p8 = scmp.lt.s32.totalorder %s373_s19, %s373_s19 }
  0x56   : > { %502 = vmatprep.subr.mxu0 %v275_v3  ;;  %p672_p4 = scmp.ne.s32.totalorder %s373_s19, %s671_s20  ;;  %p679_p9 = scmp.lt.s32.totalorder %s671_s20, %s671_s20 }
  0x57   : > { %503 = vmatpush3.msra.mxu0 %v275_v3 }
  0x58   : > { %505 = vmatmul.mubr.msk.f32.vlgmr.msra.gmra.mxu0 %vm277_vm0, %v274_v5  ;;  %p673_p7 = pnand %p672_p4, %p533_p1  ;;  %p680_p10 = por %p679_p9, %p678_p8 }
  0x59   : > { %v272_v6 = vld [vmem:[#allocation8 + $0x8] sm:$0xff]  ;;  %v271_v8 = vld [vmem:[#allocation8] sm:$0xff] }
  0x5a   : > { %p674_p12 = pneg %p673_p7 }
  0x5c   : > { %p681_p11 = pnand %p680_p10, %p674_p12 }
 0x118   : > { %v506_v7 = vpop.f32.mrf.mxu0 }
 0x119   : > { %v360_v9 = vadd.f32 %v506_v7, %v272_v6 }
 0x11a   : > { %v350_v10 = vpop.f32.mrf.mxu0 }
 0x11b   : > { %362 = vst [vmem:[#allocation8 + $0x8] sm:$0xff] %v360_v9  ;;  %v359_v11 = vadd.f32 %v350_v10, %v271_v8 }
 0x11d   : > { %361 = vst [vmem:[#allocation8] sm:$0xff] %v359_v11 }
 0x11e   : > { %684 = shalt.err (!%p681_p11)
}
 0x11f   : > { %s765_s26 = smov 128   ;;  %s766_s27 = smov 8  }
 0x120   : > { %516 = dma.vmem_to_hbm [thread:$0]  (%p533_p1), %s373_s19, 256, %s951_s3, [#allocation4], %s765_s26, %s765_s26, %s766_s27  }
 0x121   : > { %732 = dma.done.wait (%p533_p1), [#allocation4], 256  }
 0x122   : > { %734 = vsyncadd (%p533_p1), [#allocation4], 4294967040 }
 0x123 PF: > { %s20_s17 = sadd.s32 1, %s757_s17   ;;  %s956_s12 = smov %s741_s13 }
 0x124   : > { %p17_p13 = scmp.ge.s32.totalorder %s20_s17, 6   ;;  %s957_s13 = smov %s745_s14 }
 0x125   : > { %s958_s14 = smov %s865_s8  ;;  %s959_s15 = smov %s753_s16 }
 0x126   : > { %s960_s16 = smov %s962_s24  ;;  %19 = sbr.rel (!%p17_p13) target bundleno = 7 (0x7), region = 92 }
 0x12b   :  { %388 = vsyncpa [#allocation3], 1 }
 0x12c   :  { %390 = vsyncpa [#allocation3 + $0x1], 1 }
 0x12d   :  { %391 = vsyncpa [#allocation6], 1 }
 0x12e   :  { %393 = vsyncpa [#allocation6 + $0x1], 1 }
 0x12f   :  { %394 = vsyncpa [#allocation4], 1 }
 0x130   :  { %396 = vsyncpa [#allocation4 + $0x1], 1 }

</bundles_post_ra>
